<compile_context>
chip_gen: v7x
topology: tpu7x:2x2x1
jax: 0.10.0
libtpu: 0.0.40
codegen_flags: <defaults>
</compile_context>

<pallas_src>
import itertools

import numpy as np
import jax
import jax.numpy as jnp
from jax.experimental import pallas as pl
from jax.experimental.pallas import tpu as pltpu


def _make_interp_kernel(ndim, grid_sizes):
    """Build a Pallas kernel specialized for `ndim` dims of sizes `grid_sizes`."""

    def kernel(*refs):
        x_refs = refs[:ndim]                 # ndim x (1, TN) f32 query coords
        p_refs = refs[ndim:2 * ndim]         # ndim x (G_d, 1) f32 grid points
        v_ref = refs[2 * ndim]               # (prod(G_1..), G_0) f32 values^T
        o_ref = refs[2 * ndim + 1]           # (1, TN) f32 output

        tn = x_refs[0].shape[1]

        def dim_quantities(d):
            """Per-dim one-hots + normalized left/right distances (lane-dense)."""
            g = grid_sizes[d]
            xi = x_refs[d][...]                                   # (1, TN)
            p = p_refs[d][...]                                    # (G_d, 1)
            # torch.bucketize(xi, p) (right=False) == count of grid points < xi
            lt = (p < xi).astype(jnp.int32)                       # (G_d, TN)
            iright = jnp.sum(lt, axis=0, keepdims=True)           # (1, TN)
            iright = jnp.minimum(iright, g - 1)                   # clamp top
            ileft = jnp.maximum(iright - 1, 0)
            iota = jax.lax.broadcasted_iota(jnp.int32, (g, tn), 0)
            oh_l = (iota == ileft).astype(jnp.float32)            # (G_d, TN)
            oh_r = (iota == iright).astype(jnp.float32)
            p_l = jnp.sum(oh_l * p, axis=0, keepdims=True)        # p[idx_left]
            p_r = jnp.sum(oh_r * p, axis=0, keepdims=True)        # p[idx_right]
            dl = jnp.maximum(xi - p_l, 0.0)
            dr = jnp.maximum(p_r - xi, 0.0)
            both_zero = (dl == 0.0) & (dr == 0.0)
            dl = jnp.where(both_zero, 1.0, dl)
            dr = jnp.where(both_zero, 1.0, dr)
            inv = 1.0 / (dl + dr)          # fold normalization into the weights
            return oh_l, oh_r, dl * inv, dr * inv

        # --- dim 0: exact value gather on the MXU (0/1 one-hot RHS) ----------
        oh_l0, oh_r0, dl0, dr0 = dim_quantities(0)
        v = v_ref[...]                                            # (rest0, G_0)
        g_left = jnp.dot(v, oh_l0, preferred_element_type=jnp.float32)
        g_right = jnp.dot(v, oh_r0, preferred_element_type=jnp.float32)
        acc = g_left * dr0 + g_right * dl0                        # (rest0, TN)

        # --- remaining dims: separable weight contraction (small VPU work) ---
        rest = 1
        for g in grid_sizes[1:]:
            rest *= g
        for d in range(1, ndim):
            oh_l, oh_r, dl_s, dr_s = dim_quantities(d)
            w = oh_l * dr_s + oh_r * dl_s                         # (G_d, TN)
            g = grid_sizes[d]
            rest //= g
            if rest == 1:
                acc = jnp.sum(acc * w, axis=0, keepdims=True)     # (1, TN)
            else:
                acc = jnp.sum(acc.reshape(g, rest, tn) * w[:, None, :], axis=0)

        o_ref[...] = acc                                          # (1, TN)

    return kernel


def regular_grid_interpolate(points, values, x, *, tile_n=512):
    """Pallas implementation of RegularGridInterpolator.forward.

    points: list of ndim 1-D f32 arrays (sorted grid coordinates)
    values: f32 array of shape tuple(len(p) for p in points)
    x:      list of ndim 1-D f32 arrays of shape (N,) — query coordinates
    returns f32 array of shape (N,)
    """
    assert tile_n % 128 == 0, "tile_n must be a multiple of 128 (lane width)"
    ndim = len(points)
    assert len(x) == ndim
    grid_sizes = tuple(int(p.shape[0]) for p in points)
    assert tuple(values.shape) == grid_sizes
    n = int(x[0].shape[0])

    # pad query count to a multiple of tile_n (edge-padded queries are valid
    # queries and their results are discarded)
    n_pad = ((n + tile_n - 1) // tile_n) * tile_n
    x_rows = []
    for d in range(ndim):
        xd = x[d].astype(jnp.float32)
        if n_pad != n:
            xd = jnp.pad(xd, (0, n_pad - n), mode="edge")
        x_rows.append(xd.reshape(1, n_pad))

    p_cols = [p.astype(jnp.float32).reshape(-1, 1) for p in points]

    # values transposed so dim 0 is the contraction (K) axis of the MXU gather:
    # v_t[r, j0] = values[j0, j1, ..., j_{nd-1}], r = row-major (j1, ..).
    rest0 = int(np.prod(grid_sizes[1:])) if ndim > 1 else 1
    v_t = jnp.moveaxis(values.astype(jnp.float32), 0, -1).reshape(
        rest0, grid_sizes[0])

    kernel = _make_interp_kernel(ndim, grid_sizes)

    in_specs = (
        [pl.BlockSpec((1, tile_n), lambda i: (0, i)) for _ in range(ndim)]
        + [pl.BlockSpec((g, 1), lambda i: (0, 0)) for g in grid_sizes]
        + [pl.BlockSpec((rest0, grid_sizes[0]), lambda i: (0, 0))]
    )
    out_spec = pl.BlockSpec((1, tile_n), lambda i: (0, i))

    out = pl.pallas_call(
        kernel,
        out_shape=jax.ShapeDtypeStruct((1, n_pad), jnp.float32),
        grid=(n_pad // tile_n,),
        in_specs=in_specs,
        out_specs=out_spec,
        compiler_params=pltpu.CompilerParams(
            dimension_semantics=("parallel",),
            vmem_limit_bytes=32 * 1024 * 1024),
    )(*x_rows, *p_cols, v_t)

    return out[0, :n]


def _reference(points, values, x):
    """Pure-JAX reference matching the PyTorch forward semantics."""
    idxs, dists, overalls = [], [], []
    for p, xi in zip(points, x):
        idx_right = jnp.searchsorted(p, xi, side="left")
        idx_right = jnp.where(idx_right >= p.shape[0], p.shape[0] - 1, idx_right)
        idx_left = jnp.clip(idx_right - 1, 0, p.shape[0] - 1)
        dist_left = jnp.maximum(xi - p[idx_left], 0.0)
        dist_right = jnp.maximum(p[idx_right] - xi, 0.0)
        both = (dist_left == 0) & (dist_right == 0)
        dist_left = jnp.where(both, 1.0, dist_left)
        dist_right = jnp.where(both, 1.0, dist_right)
        idxs.append((idx_left, idx_right))
        dists.append((dist_left, dist_right))
        overalls.append(dist_left + dist_right)
    num = 0.0
    for indexer in itertools.product([0, 1], repeat=len(points)):
        as_s = tuple(idx[o] for o, idx in zip(indexer, idxs))
        bs = jnp.stack([dist[1 - o] for o, dist in zip(indexer, dists)]).prod(0)
        num = num + values[as_s] * bs
    den = jnp.stack(overalls).prod(0)
    return num / den


if __name__ == "__main__":
    key = jax.random.PRNGKey(0)
    k_vals, k_x0, k_x1 = jax.random.split(key, 3)

    # deterministic "parameters": a 2-D regular grid with 8 x 16 points
    G0, G1 = 8, 16
    p0 = jnp.linspace(0.0, 1.0, G0, dtype=jnp.float32)
    p1 = jnp.linspace(-1.0, 2.0, G1, dtype=jnp.float32)
    # Round the value table through bf16 so the 1e-5 check is insensitive to
    # the MXU's f32-matmul input-precision mode (the one-hot operand is exact
    # either way); the interpolation/weight math itself stays full f32.
    values = jax.random.normal(k_vals, (G0, G1), dtype=jnp.float32)
    values = values.astype(jnp.bfloat16).astype(jnp.float32)

    # query points (some intentionally outside the grid to exercise clamping);
    # N=1000 exercises the ragged-tail padding and gives a 2-step grid.
    N = 1000
    x0 = jax.random.uniform(k_x0, (N,), jnp.float32, minval=-0.2, maxval=1.2)
    x1 = jax.random.uniform(k_x1, (N,), jnp.float32, minval=-1.5, maxval=2.5)

    out = regular_grid_interpolate([p0, p1], values, [x0, x1])
    out = jax.block_until_ready(out)

    ref = _reference([p0, p1], values, [x0, x1])
    np.testing.assert_allclose(np.asarray(out), np.asarray(ref),
                               rtol=1e-5, atol=1e-5)
    print("KERNEL_OK")
</pallas_src>

<mosaic_0001>
module attributes {stable_mosaic.version = 11 : i64} {
  func.func @kernel(%arg0: i32, %arg1: memref<1x512xf32, #tpu.memory_space<vmem>>, %arg2: memref<1x512xf32, #tpu.memory_space<vmem>>, %arg3: memref<8x1xf32, #tpu.memory_space<vmem>>, %arg4: memref<16x1xf32, #tpu.memory_space<vmem>>, %arg5: memref<16x8xf32, #tpu.memory_space<vmem>>, %arg6: memref<1x512xf32, #tpu.memory_space<vmem>>) attributes {dimension_semantics = [#tpu.dimension_semantics<parallel>], iteration_bounds = array<i64: 2>, scalar_prefetch = 0 : i64, scratch_operands = 0 : i64, tpu.core_type = #tpu.core_type<tc>, window_params = [{transform_indices = @transform_0, window_bounds = array<i64: 1, 512>}, {transform_indices = @transform_1, window_bounds = array<i64: 1, 512>}, {pipeline_mode = #tpu.pipeline_mode<synchronous>, transform_indices = @transform_2, window_bounds = array<i64: 8, 1>}, {pipeline_mode = #tpu.pipeline_mode<synchronous>, transform_indices = @transform_3, window_bounds = array<i64: 16, 1>}, {pipeline_mode = #tpu.pipeline_mode<synchronous>, transform_indices = @transform_4, window_bounds = array<i64: 16, 8>}, {transform_indices = @transform_5, window_bounds = array<i64: 1, 512>}]} {
    %c0 = arith.constant 0 : index
    %c0_0 = arith.constant 0 : index
    %0 = vector.load %arg1[%c0, %c0_0] : memref<1x512xf32, #tpu.memory_space<vmem>>, vector<1x512xf32>
    %c0_1 = arith.constant 0 : index
    %c0_2 = arith.constant 0 : index
    %1 = vector.load %arg3[%c0_1, %c0_2] : memref<8x1xf32, #tpu.memory_space<vmem>>, vector<8x1xf32>
    %2 = vector.broadcast %1 : vector<8x1xf32> to vector<8x512xf32>
    %3 = vector.broadcast %0 : vector<1x512xf32> to vector<8x512xf32>
    %4 = arith.cmpf olt, %2, %3 : vector<8x512xf32>
    %5 = arith.extui %4 : vector<8x512xi1> to vector<8x512xi32>
    %cst = arith.constant dense<0> : vector<512xi32>
    %6 = vector.multi_reduction <add>, %5, %cst [0] : vector<8x512xi32> to vector<512xi32>
    %7 = vector.shape_cast %6 : vector<512xi32> to vector<1x512xi32>
    %c7_i32 = arith.constant 7 : i32
    %8 = vector.broadcast %c7_i32 : i32 to vector<1x512xi32>
    %9 = arith.minsi %7, %8 : vector<1x512xi32>
    %c1_i32 = arith.constant 1 : i32
    %10 = vector.broadcast %c1_i32 : i32 to vector<1x512xi32>
    %11 = arith.subi %9, %10 : vector<1x512xi32>
    %c0_i32 = arith.constant 0 : i32
    %12 = vector.broadcast %c0_i32 : i32 to vector<1x512xi32>
    %13 = arith.maxsi %11, %12 : vector<1x512xi32>
    %14 = tpu.iota {dimensions = array<i32: 0>} : vector<8x512xi32>
    %15 = vector.broadcast %13 : vector<1x512xi32> to vector<8x512xi32>
    %16 = arith.cmpi eq, %14, %15 : vector<8x512xi32>
    %17 = arith.extui %16 : vector<8x512xi1> to vector<8x512xi32>
    %18 = arith.sitofp %17 : vector<8x512xi32> to vector<8x512xf32>
    %19 = vector.broadcast %9 : vector<1x512xi32> to vector<8x512xi32>
    %20 = arith.cmpi eq, %14, %19 : vector<8x512xi32>
    %21 = arith.extui %20 : vector<8x512xi1> to vector<8x512xi32>
    %22 = arith.sitofp %21 : vector<8x512xi32> to vector<8x512xf32>
    %23 = vector.broadcast %1 : vector<8x1xf32> to vector<8x512xf32>
    %24 = arith.mulf %18, %23 : vector<8x512xf32>
    %cst_3 = arith.constant dense<0.000000e+00> : vector<512xf32>
    %25 = vector.multi_reduction <add>, %24, %cst_3 [0] : vector<8x512xf32> to vector<512xf32>
    %26 = vector.shape_cast %25 : vector<512xf32> to vector<1x512xf32>
    %27 = vector.broadcast %1 : vector<8x1xf32> to vector<8x512xf32>
    %28 = arith.mulf %22, %27 : vector<8x512xf32>
    %cst_4 = arith.constant dense<0.000000e+00> : vector<512xf32>
    %29 = vector.multi_reduction <add>, %28, %cst_4 [0] : vector<8x512xf32> to vector<512xf32>
    %30 = vector.shape_cast %29 : vector<512xf32> to vector<1x512xf32>
    %31 = arith.subf %0, %26 : vector<1x512xf32>
    %cst_5 = arith.constant 0.000000e+00 : f32
    %32 = vector.broadcast %cst_5 : f32 to vector<1x512xf32>
    %33 = arith.maximumf %31, %32 : vector<1x512xf32>
    %34 = arith.subf %30, %0 : vector<1x512xf32>
    %cst_6 = arith.constant 0.000000e+00 : f32
    %35 = vector.broadcast %cst_6 : f32 to vector<1x512xf32>
    %36 = arith.maximumf %34, %35 : vector<1x512xf32>
    %cst_7 = arith.constant 0.000000e+00 : f32
    %37 = vector.broadcast %cst_7 : f32 to vector<1x512xf32>
    %38 = arith.cmpf oeq, %33, %37 : vector<1x512xf32>
    %cst_8 = arith.constant 0.000000e+00 : f32
    %39 = vector.broadcast %cst_8 : f32 to vector<1x512xf32>
    %40 = arith.cmpf oeq, %36, %39 : vector<1x512xf32>
    %41 = arith.andi %38, %40 : vector<1x512xi1>
    %cst_9 = arith.constant 1.000000e+00 : f32
    %42 = vector.broadcast %cst_9 : f32 to vector<1x512xf32>
    %43 = arith.select %41, %42, %33 : vector<1x512xi1>, vector<1x512xf32>
    %cst_10 = arith.constant 1.000000e+00 : f32
    %44 = vector.broadcast %cst_10 : f32 to vector<1x512xf32>
    %45 = arith.select %41, %44, %36 : vector<1x512xi1>, vector<1x512xf32>
    %46 = arith.addf %43, %45 : vector<1x512xf32>
    %cst_11 = arith.constant 1.000000e+00 : f32
    %47 = vector.broadcast %cst_11 : f32 to vector<1x512xf32>
    %48 = arith.divf %47, %46 : vector<1x512xf32>
    %49 = arith.mulf %43, %48 : vector<1x512xf32>
    %50 = arith.mulf %45, %48 : vector<1x512xf32>
    %c0_12 = arith.constant 0 : index
    %c0_13 = arith.constant 0 : index
    %51 = vector.load %arg5[%c0_12, %c0_13] : memref<16x8xf32, #tpu.memory_space<vmem>>, vector<16x8xf32>
    %cst_14 = arith.constant dense<0.000000e+00> : vector<16x512xf32>
    %52 = tpu.matmul %51, %18, %cst_14 {dimension_numbers = #tpu.dot_dimension_numbers<[1], [0], [0], [1], [0, 0, 1, 1], [], []>} : vector<16x8xf32>, vector<8x512xf32>, vector<16x512xf32> -> vector<16x512xf32>
    %cst_15 = arith.constant dense<0.000000e+00> : vector<16x512xf32>
    %53 = tpu.matmul %51, %22, %cst_15 {dimension_numbers = #tpu.dot_dimension_numbers<[1], [0], [0], [1], [0, 0, 1, 1], [], []>} : vector<16x8xf32>, vector<8x512xf32>, vector<16x512xf32> -> vector<16x512xf32>
    %54 = vector.broadcast %50 : vector<1x512xf32> to vector<16x512xf32>
    %55 = arith.mulf %52, %54 : vector<16x512xf32>
    %56 = vector.broadcast %49 : vector<1x512xf32> to vector<16x512xf32>
    %57 = arith.mulf %53, %56 : vector<16x512xf32>
    %58 = arith.addf %55, %57 : vector<16x512xf32>
    %c0_16 = arith.constant 0 : index
    %c0_17 = arith.constant 0 : index
    %59 = vector.load %arg2[%c0_16, %c0_17] : memref<1x512xf32, #tpu.memory_space<vmem>>, vector<1x512xf32>
    %c0_18 = arith.constant 0 : index
    %c0_19 = arith.constant 0 : index
    %60 = vector.load %arg4[%c0_18, %c0_19] : memref<16x1xf32, #tpu.memory_space<vmem>>, vector<16x1xf32>
    %61 = vector.broadcast %60 : vector<16x1xf32> to vector<16x512xf32>
    %62 = vector.broadcast %59 : vector<1x512xf32> to vector<16x512xf32>
    %63 = arith.cmpf olt, %61, %62 : vector<16x512xf32>
    %64 = arith.extui %63 : vector<16x512xi1> to vector<16x512xi32>
    %cst_20 = arith.constant dense<0> : vector<512xi32>
    %65 = vector.multi_reduction <add>, %64, %cst_20 [0] : vector<16x512xi32> to vector<512xi32>
    %66 = vector.shape_cast %65 : vector<512xi32> to vector<1x512xi32>
    %c15_i32 = arith.constant 15 : i32
    %67 = vector.broadcast %c15_i32 : i32 to vector<1x512xi32>
    %68 = arith.minsi %66, %67 : vector<1x512xi32>
    %c1_i32_21 = arith.constant 1 : i32
    %69 = vector.broadcast %c1_i32_21 : i32 to vector<1x512xi32>
    %70 = arith.subi %68, %69 : vector<1x512xi32>
    %c0_i32_22 = arith.constant 0 : i32
    %71 = vector.broadcast %c0_i32_22 : i32 to vector<1x512xi32>
    %72 = arith.maxsi %70, %71 : vector<1x512xi32>
    %73 = tpu.iota {dimensions = array<i32: 0>} : vector<16x512xi32>
    %74 = vector.broadcast %72 : vector<1x512xi32> to vector<16x512xi32>
    %75 = arith.cmpi eq, %73, %74 : vector<16x512xi32>
    %76 = arith.extui %75 : vector<16x512xi1> to vector<16x512xi32>
    %77 = arith.sitofp %76 : vector<16x512xi32> to vector<16x512xf32>
    %78 = vector.broadcast %68 : vector<1x512xi32> to vector<16x512xi32>
    %79 = arith.cmpi eq, %73, %78 : vector<16x512xi32>
    %80 = arith.extui %79 : vector<16x512xi1> to vector<16x512xi32>
    %81 = arith.sitofp %80 : vector<16x512xi32> to vector<16x512xf32>
    %82 = vector.broadcast %60 : vector<16x1xf32> to vector<16x512xf32>
    %83 = arith.mulf %77, %82 : vector<16x512xf32>
    %cst_23 = arith.constant dense<0.000000e+00> : vector<512xf32>
    %84 = vector.multi_reduction <add>, %83, %cst_23 [0] : vector<16x512xf32> to vector<512xf32>
    %85 = vector.shape_cast %84 : vector<512xf32> to vector<1x512xf32>
    %86 = vector.broadcast %60 : vector<16x1xf32> to vector<16x512xf32>
    %87 = arith.mulf %81, %86 : vector<16x512xf32>
    %cst_24 = arith.constant dense<0.000000e+00> : vector<512xf32>
    %88 = vector.multi_reduction <add>, %87, %cst_24 [0] : vector<16x512xf32> to vector<512xf32>
    %89 = vector.shape_cast %88 : vector<512xf32> to vector<1x512xf32>
    %90 = arith.subf %59, %85 : vector<1x512xf32>
    %cst_25 = arith.constant 0.000000e+00 : f32
    %91 = vector.broadcast %cst_25 : f32 to vector<1x512xf32>
    %92 = arith.maximumf %90, %91 : vector<1x512xf32>
    %93 = arith.subf %89, %59 : vector<1x512xf32>
    %cst_26 = arith.constant 0.000000e+00 : f32
    %94 = vector.broadcast %cst_26 : f32 to vector<1x512xf32>
    %95 = arith.maximumf %93, %94 : vector<1x512xf32>
    %cst_27 = arith.constant 0.000000e+00 : f32
    %96 = vector.broadcast %cst_27 : f32 to vector<1x512xf32>
    %97 = arith.cmpf oeq, %92, %96 : vector<1x512xf32>
    %cst_28 = arith.constant 0.000000e+00 : f32
    %98 = vector.broadcast %cst_28 : f32 to vector<1x512xf32>
    %99 = arith.cmpf oeq, %95, %98 : vector<1x512xf32>
    %100 = arith.andi %97, %99 : vector<1x512xi1>
    %cst_29 = arith.constant 1.000000e+00 : f32
    %101 = vector.broadcast %cst_29 : f32 to vector<1x512xf32>
    %102 = arith.select %100, %101, %92 : vector<1x512xi1>, vector<1x512xf32>
    %cst_30 = arith.constant 1.000000e+00 : f32
    %103 = vector.broadcast %cst_30 : f32 to vector<1x512xf32>
    %104 = arith.select %100, %103, %95 : vector<1x512xi1>, vector<1x512xf32>
    %105 = arith.addf %102, %104 : vector<1x512xf32>
    %cst_31 = arith.constant 1.000000e+00 : f32
    %106 = vector.broadcast %cst_31 : f32 to vector<1x512xf32>
    %107 = arith.divf %106, %105 : vector<1x512xf32>
    %108 = arith.mulf %102, %107 : vector<1x512xf32>
    %109 = arith.mulf %104, %107 : vector<1x512xf32>
    %110 = vector.broadcast %109 : vector<1x512xf32> to vector<16x512xf32>
    %111 = arith.mulf %77, %110 : vector<16x512xf32>
    %112 = vector.broadcast %108 : vector<1x512xf32> to vector<16x512xf32>
    %113 = arith.mulf %81, %112 : vector<16x512xf32>
    %114 = arith.addf %111, %113 : vector<16x512xf32>
    %115 = arith.mulf %58, %114 : vector<16x512xf32>
    %cst_32 = arith.constant dense<0.000000e+00> : vector<512xf32>
    %116 = vector.multi_reduction <add>, %115, %cst_32 [0] : vector<16x512xf32> to vector<512xf32>
    %117 = vector.shape_cast %116 : vector<512xf32> to vector<1x512xf32>
    %c0_33 = arith.constant 0 : index
    %c0_34 = arith.constant 0 : index
    %118 = vector.load %arg6[%c0_33, %c0_34] : memref<1x512xf32, #tpu.memory_space<vmem>>, vector<1x512xf32>
    tpu.vector_store %arg6[%c0_33, %c0_34], %117 {strides = array<i32>} : memref<1x512xf32, #tpu.memory_space<vmem>>, vector<1x512xf32>,
    return
  }
  func.func @transform_0(%arg0: i32) -> (i32, i32) {
    %c0_i32 = arith.constant 0 : i32
    %c0_i32_0 = arith.constant 0 : i32
    return %c0_i32, %arg0 : i32, i32
  }
  func.func @transform_1(%arg0: i32) -> (i32, i32) {
    %c0_i32 = arith.constant 0 : i32
    %c0_i32_0 = arith.constant 0 : i32
    return %c0_i32, %arg0 : i32, i32
  }
  func.func @transform_2(%arg0: i32) -> (i32, i32) {
    %c0_i32 = arith.constant 0 : i32
    %c0_i32_0 = arith.constant 0 : i32
    %c0_i32_1 = arith.constant 0 : i32
    return %c0_i32, %c0_i32_0 : i32, i32
  }
  func.func @transform_3(%arg0: i32) -> (i32, i32) {
    %c0_i32 = arith.constant 0 : i32
    %c0_i32_0 = arith.constant 0 : i32
    %c0_i32_1 = arith.constant 0 : i32
    return %c0_i32, %c0_i32_0 : i32, i32
  }
  func.func @transform_4(%arg0: i32) -> (i32, i32) {
    %c0_i32 = arith.constant 0 : i32
    %c0_i32_0 = arith.constant 0 : i32
    %c0_i32_1 = arith.constant 0 : i32
    return %c0_i32, %c0_i32_0 : i32, i32
  }
  func.func @transform_5(%arg0: i32) -> (i32, i32) {
    %c0_i32 = arith.constant 0 : i32
    %c0_i32_0 = arith.constant 0 : i32
    return %c0_i32, %arg0 : i32, i32
  }
}

</mosaic_0001>

<bundles_post_ra>
// kernel: tpu_custom_call.1
= control target key start
LH: loop header
LB: loop body
LE: loop exit
PB: predicated region body
PF: predicated region fallthrough
CT: control target
= control target key end

     0   :  { %10 = vsyncpa [#allocation3], 0  ;;  %s2117_s0 = inlined_call_operand.vmem [shape: f32[1,1024], index: 0, kind: input, shape index: {}]   ;;  %s2118_s1 = inlined_call_operand.vmem [shape: f32[1,1024], index: 1, kind: input, shape index: {}]   ;;  %s2119_s2 = inlined_call_operand.vmem [shape: f32[8,1], index: 2, kind: input, shape index: {}]   ;;  %s2120_s3 = inlined_call_operand.vmem [shape: f32[16,1], index: 3, kind: input, shape index: {}]   ;;  %s2121_s4 = inlined_call_operand.vmem [shape: f32[16,8], index: 4, kind: input, shape index: {}]   ;;  %s2122_s5 = inlined_call_operand.hbm [shape: f32[1,1024], index: 5, kind: output, shape index: {}]  }
   0x1   :  { %12 = vsyncpa [#allocation3 + $0x1], 0  ;;  %s1651_s18 = smov 0   ;;  %s1653_s19 = smov 0  }
   0x2   :  { %s1655_s20 = smov 0   ;;  %s1657_s21 = smov 0  }
   0x3 LB: > { %s1672_s22 = sadd.s32 4294967295, %s1614_s21   ;;  %s1442_s23 = sadd.s32 4294967294, %s1614_s21   ;;  %s1614_s21 = sphi %s1657_s21, %s2133_s21   ;;  %s1610_s20 = sphi %s1655_s20, %s2132_s20   ;;  %s1606_s19 = sphi %s1653_s19, %s2131_s19   ;;  %s1602_s18 = sphi %s1651_s18, %s2130_s18  }
   0x4   : > { %s1676_s24 = sadd.s32 1, %s1614_s21   ;;  %s140_s25 = sadd.s32 1, %s1610_s20 }
   0x5   : > { %s137_s26 = ssub.s32 %s1614_s21, %s1676_s24  ;;  %p150_p0 = scmp.ne.s32.totalorder %s1610_s20, %s1606_s19 }
   0x6   : > { %p138_p1 = scmp.eq.s32.totalorder %s137_s26, 0  ;;  %p151_p2 = scmp.eq.s32.totalorder %s1672_s22, 1 }
   0x7   : > { %p156_p3 = scmp.ne.s32.totalorder %s1606_s19, %s1602_s18  ;;  %p157_p4 = scmp.eq.s32.totalorder %s1442_s23, 1 }
   0x8   : > { %s1687_s27 = scalar_select %p138_p1, %s1610_s20, %s140_s25  }
   0x9   : > { %p1689_p5 = por %p151_p2, %p150_p0  ;;  %p1693_p6 = por %p157_p4, %p156_p3 }
   0xa   : > { %p1445_p7 = scmp.ge.s32.totalorder %s1614_s21, 1  ;;  %p200_p8 = scmp.lt.s32.totalorder %s1614_s21, 3 }
   0xc   : > { %p201_p9 = pnand %p1445_p7, %p200_p8 }
   0xd   : > { %v243_v0 = vld [vmem:[%s2119_s2] sm:$0xff] (!%p201_p9)  ;;  %v899_v1 = vld [vmem:[%s2120_s3 + $0x8] sm:$0xff] (!%p201_p9)  ;;  %v2124_v2 = vmov (!%p201_p9), 0   ;;  %v1617_v4 = vmov (!%p201_p9), 0.0   ;;  %s1447_s11 = sshll.u32 (!%p201_p9), %s1672_s22, 2  ;;  %v2123_v5 = vlaneseq (!%p201_p9)  ;;  %vm516_vm8 = vcmask (!%p201_p9), 64512  }
   0xe   : > { %204 = sbr.rel (%p201_p9) target bundleno = 434 (0x1b2), region = 40  ;;  %1546 = vset.pattern.permute.xlu0 (!%p201_p9), %v2124_v2  ;;  %1547 = vset.pattern.permute.xlu1 (!%p201_p9), %v2124_v2  ;;  %v898_v3 = vld [vmem:[%s2120_s3] sm:$0xff] (!%p201_p9)  ;;  %p232_p10 = scmp.lt.s32.totalorder (!%p201_p9), %s1447_s11, 7  ;;  %v1618_v56 = vmov (!%p201_p9), 1.0  }
   0xf   : > { %246 = vperm.xlu0 (!%p201_p9), %1546, %v243_v0   ;;  %907 = vperm.xlu1 (!%p201_p9), %1547, %v899_v1   ;;  %v1716_v6 = vshrl.u32 (!%p201_p9), %v2123_v5, 7  ;;  %v1791_v0 = vld [vmem:[%s2121_s4] sm:$0xff] (!%p201_p9)  ;;  %s228_s6 = sand.u32 (!%p201_p9), 1, %s1606_s19   ;;  %s1502_s8 = sshll.u32 (!%p201_p9), %s1672_s22, 6 }
  0x10   : > { %587 = vmatprep.mubr.f32.mxu0 (!%p201_p9), %v1617_v4  ;;  %664 = vmatprep.mubr.f32.mxu1 (!%p201_p9), %v1617_v4  ;;  %s1446_s7 = sshll.u32 (!%p201_p9), %s228_s6, 2  ;;  %s2075_s13 = scalar_lea.hbm (!%p201_p9), %s2122_s5, %s1502_s8 }
  0x11   : > { %v1723_v7 = vsub.s32 (!%p201_p9), 3, %v1716_v6  ;;  %v1726_v8 = vsub.s32 (!%p201_p9), 1, %v1716_v6  ;;  %v1731_v10 = vsub.s32 (!%p201_p9), 2, %v1716_v6  ;;  %v1734_v11 = vsub.s32 (!%p201_p9), 0, %v1716_v6  ;;  %s230_s9 = scalar_lea.vmem (!%p201_p9), [#allocation2], %s1446_s7  ;;  %s1620_s15 = smov (!%p201_p9), [#allocation2]  }
  0x12   : > { %s1377_s10 = sshll.u32 (!%p201_p9), %s230_s9, 4  ;;  %s1556_s16 = sshll.u32 (!%p201_p9), %s1620_s15, 4  ;;  %s2077_s10 = int_to_ptr.vmem [resolvable:$true] %s1377_s10  ;;  %s1557_s16 = int_to_ptr.vmem [resolvable:$false] %s1556_s16 }
  0x13   : > { %902 = vperm.xlu0 (!%p201_p9), %1546, %v898_v3   ;;  %s1552_s22 = scalar_lea.vmem (!%p201_p9), %s2077_s10, 64  ;;  %s1558_s17 = scalar_lea.vmem (!%p201_p9), %s1557_s16, 128 }
  0x14   : > { %p1553_p11 = scmp.ne.s32.totalorder (!%p201_p9), %s2077_s10, %s1552_s22  ;;  %p1559_p0 = scmp.lt.s32.totalorder (!%p201_p9), %s2077_s10, %s1557_s16 }
  0x15   : > { %s2135_s11 = smov (!%p232_p10, %s1447_s11), 7  ;;  %p1560_p1 = scmp.lt.s32.totalorder %s1558_s17, %s1552_s22 }
  0x16   : > { %s234_s14 = scalar_lea.vmem %s2117_s0, %s2135_s11  ;;  %s239_s30 = scalar_lea.vmem %s2118_s1, %s2135_s11 }
  0x17   : > { %v1728_v9 = vld [vmem:[%s234_s14] sm:$0xf]  ;;  %s1363_s14 = scalar_lea.sflag [#allocation3], %s228_s6  ;;  %p1554_p12 = pnand %p1553_p11, %p1689_p5 }
  0x18   : > { %v1738_v12 = vrot.slane %v1728_v9, %v1726_v8  ;;  %v1742_v13 = vrot.slane %v1728_v9, %v1723_v7  ;;  %v1746_v14 = vrot.slane %v1728_v9, %v1734_v11  ;;  %v1750_v15 = vrot.slane %v1728_v9, %v1731_v10  ;;  %p1561_p2 = por %p1560_p1, %p1559_p0 }
  0x19   : > { %p1555_p13 = pneg %p1554_p12 }
  0x1b   : > { %p1562_p3 = pnand %p1561_p2, %p1555_p13 }
  0x8e   : > { %v1752_v16 = vpop.permute.xlu0 %246 }
  0x8f   : > { %vm271_vm0 = vcmp.lt.f32.partialorder %v1752_v16, %v1738_v12  ;;  %vm273_vm1 = vcmp.lt.f32.partialorder %v1752_v16, %v1742_v13  ;;  %vm270_vm2 = vcmp.lt.f32.partialorder %v1752_v16, %v1746_v14  ;;  %vm272_vm3 = vcmp.lt.f32.partialorder %v1752_v16, %v1750_v15 }
  0x90   : > { %v275_v17 = vsel %vm271_vm0, 1, %v2124_v2  ;;  %v277_v18 = vsel %vm273_vm1, 1, %v2124_v2  ;;  %v274_v21 = vsel %vm270_vm2, 1, %v2124_v2  ;;  %v276_v22 = vsel %vm272_vm3, 1, %v2124_v2 }
  0x91   : > { %v284_v19 = vrot.slane %v275_v17, 4  ;;  %v296_v20 = vrot.slane %v277_v18, 4  ;;  %v278_v25 = vrot.slane %v274_v21, 4  ;;  %v290_v26 = vrot.slane %v276_v22, 4 }
  0x93   : > { %v285_v23 = vadd.s32 %v284_v19, %v275_v17  ;;  %v297_v24 = vadd.s32 %v296_v20, %v277_v18  ;;  %v279_v29 = vadd.s32 %v278_v25, %v274_v21  ;;  %v291_v30 = vadd.s32 %v290_v26, %v276_v22 }
  0x95   : > { %v286_v27 = vrot.slane %v285_v23, 2  ;;  %v298_v28 = vrot.slane %v297_v24, 2  ;;  %v280_v33 = vrot.slane %v279_v29, 2  ;;  %v292_v34 = vrot.slane %v291_v30, 2 }
  0x97   : > { %v287_v31 = vadd.s32 %v286_v27, %v285_v23  ;;  %v299_v32 = vadd.s32 %v298_v28, %v297_v24  ;;  %v281_v37 = vadd.s32 %v280_v33, %v279_v29  ;;  %v293_v38 = vadd.s32 %v292_v34, %v291_v30 }
  0x98   : > { %v1619_v27 = vmov 1966171168  }
  0x99   : > { %v288_v35 = vrot.slane %v287_v31, 1  ;;  %v300_v36 = vrot.slane %v299_v32, 1  ;;  %v282_v41 = vrot.slane %v281_v37, 1  ;;  %v294_v42 = vrot.slane %v293_v38, 1 }
  0x9a   : > { %v411_v28 = vunpack.c.l.s4 %v1619_v27 }
  0x9b   : > { %v289_v39 = vadd.s32 %v288_v35, %v287_v31  ;;  %v301_v40 = vadd.s32 %v300_v36, %v299_v32  ;;  %v283_v45 = vadd.s32 %v282_v41, %v281_v37  ;;  %v295_v46 = vadd.s32 %v294_v42, %v293_v38  ;;  %v515_v35 = vld [vmem:[%s2121_s4 + $0x8] sm:$0xff] }
  0x9d   : > { %vm304_vm4 = vcmp.lt.s32.totalorder %v289_v39, 7  ;;  %vm308_vm5 = vcmp.lt.s32.totalorder %v301_v40, 7  ;;  %vm302_vm6 = vcmp.lt.s32.totalorder %v283_v45, 7  ;;  %vm306_vm7 = vcmp.lt.s32.totalorder %v295_v46, 7 }
  0x9e   : > { %v305_v43 = vsel %vm304_vm4, %v289_v39, 7  ;;  %v1766_v44 = vsel %vm308_vm5, %v301_v40, 7  ;;  %v303_v51 = vsel %vm302_vm6, %v283_v45, 7  ;;  %v1772_v52 = vsel %vm306_vm7, %v295_v46, 7 }
  0x9f   : > { %v1450_v47 = vadd.s32 4294967295, %v305_v43  ;;  %v1452_v48 = vadd.s32 4294967295, %v1766_v44  ;;  %vm337_vm11 = vcmp.eq.s32.totalorder %v1716_v6, %v305_v43  ;;  %vm339_vm12 = vcmp.eq.s32.totalorder %v1716_v6, %v1766_v44 }
  0xa0   : > { %v1449_v53 = vadd.s32 4294967295, %v303_v51  ;;  %v1451_v54 = vadd.s32 4294967295, %v1772_v52  ;;  %v1458_v58 = vsel %vm337_vm11, 1.0, %v1617_v4  ;;  %v1460_v59 = vsel %vm339_vm12, 1.0, %v1617_v4 }
  0xa1   : > { %vm316_vm9 = vcmp.gt.s32.totalorder %v1450_v47, 0  ;;  %vm320_vm10 = vcmp.gt.s32.totalorder %v1452_v48, 0  ;;  %v377_v1 = vmul.f32 %v1458_v58, %v1752_v16  ;;  %v379_v3 = vmul.f32 %v1460_v59, %v1752_v16 }
  0xa2   : > { %v317_v49 = vsel %vm316_vm9, %v1450_v47, 0  ;;  %v321_v50 = vsel %vm320_vm10, %v1452_v48, 0  ;;  %vm314_vm15 = vcmp.gt.s32.totalorder %v1449_v53, 0  ;;  %vm318_vm0 = vcmp.gt.s32.totalorder %v1451_v54, 0 }
  0xa3   : > { %vm325_vm13 = vcmp.eq.s32.totalorder %v1716_v6, %v317_v49  ;;  %vm327_vm14 = vcmp.eq.s32.totalorder %v1716_v6, %v321_v50  ;;  %v315_v62 = vsel %vm314_vm15, %v1449_v53, 0  ;;  %v319_v63 = vsel %vm318_vm0, %v1451_v54, 0 }
  0xa4   : > { %v1454_v55 = vsel %vm325_vm13, 1.0, %v1617_v4  ;;  %1461 = vmatprep.subr.msk.mxu0 %vm325_vm13, %v1618_v56  ;;  %v1456_v57 = vsel %vm327_vm14, 1.0, %v1617_v4  ;;  %1465 = vmatprep.subr.msk.mxu1 %vm327_vm14, %v1618_v56  ;;  %vm324_vm1 = vcmp.eq.s32.totalorder %v1716_v6, %v315_v62  ;;  %vm326_vm2 = vcmp.eq.s32.totalorder %v1716_v6, %v319_v63 }
  0xa5   : > { %v349_v60 = vmul.f32 %v1454_v55, %v1752_v16  ;;  %v351_v61 = vmul.f32 %v1456_v57, %v1752_v16  ;;  %v1453_v19 = vsel %vm324_vm1, 1.0, %v1617_v4  ;;  %1462 = vmatpush1.msk.msra.mxu0 %vm324_vm1, %v1618_v56  ;;  %v1455_v20 = vsel %vm326_vm2, 1.0, %v1617_v4  ;;  %1466 = vmatpush1.msk.msra.mxu1 %vm326_vm2, %v1618_v56 }
  0xa6   : > { %v386_v21 = vrot.slane %v377_v1, 4  ;;  %v398_v22 = vrot.slane %v379_v3, 4  ;;  %v348_v25 = vmul.f32 %v1453_v19, %v1752_v16  ;;  %v350_v26 = vmul.f32 %v1455_v20, %v1752_v16  ;;  %1463 = vmatmul.mubr.msk.f32.vlgmr.msra.gmra.mrb[0].mxu0 %vm516_vm8, %v1791_v0  ;;  %1467 = vmatmul.mubr.msk.f32.vlgmr.msra.gmra.mrb[0].mxu1 %vm516_vm8, %v1791_v0 }
  0xa7   : > { %v358_v17 = vrot.slane %v349_v60, 4  ;;  %v370_v18 = vrot.slane %v351_v61, 4  ;;  %1469 = vmatprep.subr.msk.mxu0 %vm337_vm11, %v1618_v56  ;;  %vm336_vm3 = vcmp.eq.s32.totalorder %v1716_v6, %v303_v51  ;;  %1473 = vmatprep.subr.msk.mxu1 %vm339_vm12, %v1618_v56  ;;  %vm338_vm4 = vcmp.eq.s32.totalorder %v1716_v6, %v1772_v52 }
  0xa8   : > { %v387_v29 = vadd.f32 %v386_v21, %v377_v1  ;;  %v399_v30 = vadd.f32 %v398_v22, %v379_v3  ;;  %v352_v33 = vrot.slane %v348_v25, 4  ;;  %v364_v34 = vrot.slane %v350_v26, 4  ;;  %1470 = vmatpush1.msk.msra.mxu0 %vm336_vm3, %v1618_v56  ;;  %593 = vmatprep.mubr.f32.mxu0 %v1617_v4 }
  0xa9   : > { %v359_v23 = vadd.f32 %v358_v17, %v349_v60  ;;  %v371_v24 = vadd.f32 %v370_v18, %v351_v61  ;;  %v1457_v38 = vsel %vm336_vm3, 1.0, %v1617_v4  ;;  %670 = vmatprep.mubr.f32.mxu1 %v1617_v4  ;;  %1474 = vmatpush1.msk.msra.mxu1 %vm338_vm4, %v1618_v56  ;;  %v1459_v46 = vsel %vm338_vm4, 1.0, %v1617_v4 }
  0xaa   : > { %v388_v36 = vrot.slane %v387_v29, 2  ;;  %v400_v37 = vrot.slane %v399_v30, 2  ;;  %v353_v41 = vadd.f32 %v352_v33, %v348_v25  ;;  %v365_v42 = vadd.f32 %v364_v34, %v350_v26  ;;  %1464 = vmatmul.mubr.msk.f32.gmra.mrb[2].mxu0 %vm516_vm8, %v515_v35  ;;  %1468 = vmatmul.mubr.msk.f32.gmra.mrb[2].mxu1 %vm516_vm8, %v515_v35 }
  0xab   : > { %v360_v31 = vrot.slane %v359_v23, 2  ;;  %v372_v32 = vrot.slane %v371_v24, 2  ;;  %v376_v45 = vmul.f32 %v1457_v38, %v1752_v16  ;;  %741 = vmatprep.mubr.f32.mxu0 %v1617_v4  ;;  %818 = vmatprep.mubr.f32.mxu1 %v1617_v4  ;;  %v378_v54 = vmul.f32 %v1459_v46, %v1752_v16 }
  0xac   : > { %v389_v43 = vadd.f32 %v388_v36, %v387_v29  ;;  %v401_v44 = vadd.f32 %v400_v37, %v399_v30  ;;  %v354_v49 = vrot.slane %v353_v41, 2  ;;  %v366_v50 = vrot.slane %v365_v42, 2 }
  0xad   : > { %v361_v39 = vadd.f32 %v360_v31, %v359_v23  ;;  %v373_v40 = vadd.f32 %v372_v32, %v371_v24  ;;  %v380_v53 = vrot.slane %v376_v45, 4  ;;  %v412_v56 = vunpack.c.0.s8 %v411_v28 }
  0xae   : > { %v390_v51 = vrot.slane %v389_v43, 1  ;;  %v402_v52 = vrot.slane %v401_v44, 1  ;;  %v355_v55 = vadd.f32 %v354_v49, %v353_v41  ;;  %v367_v57 = vadd.f32 %v366_v50, %v365_v42  ;;  %1471 = vmatmul.mubr.msk.f32.vlgmr.msra.gmra.mrb[4].mxu0 %vm516_vm8, %v1791_v0  ;;  %1475 = vmatmul.mubr.msk.f32.vlgmr.msra.gmra.mrb[4].mxu1 %vm516_vm8, %v1791_v0 }
  0xaf   : > { %v362_v47 = vrot.slane %v361_v39, 1  ;;  %v374_v48 = vrot.slane %v373_v40, 1  ;;  %v381_v60 = vadd.f32 %v380_v53, %v376_v45  ;;  %v392_v61 = vrot.slane %v378_v54, 4  ;;  %747 = vmatprep.mubr.f32.mxu0 %v1617_v4  ;;  %824 = vmatprep.mubr.f32.mxu1 %v1617_v4 }
  0xb0   : > { %v391_v58 = vadd.f32 %v390_v51, %v389_v43  ;;  %v403_v59 = vadd.f32 %v402_v52, %v401_v44  ;;  %v356_v1 = vrot.slane %v355_v55, 1  ;;  %v368_v3 = vrot.slane %v367_v57, 1 }
  0xb1   : > { %v363_v62 = vadd.f32 %v362_v47, %v361_v39  ;;  %v375_v63 = vadd.f32 %v374_v48, %v373_v40  ;;  %v382_v18 = vrot.slane %v381_v60, 2  ;;  %v393_v19 = vadd.f32 %v392_v61, %v378_v54 }
  0xb2   : > { %v436_v16 = vsub.f32 %v391_v58, %v1738_v12  ;;  %v438_v17 = vsub.f32 %v403_v59, %v1742_v13  ;;  %v357_v20 = vadd.f32 %v356_v1, %v355_v55  ;;  %v1835_v21 = vsub.s32 %v412_v56, %v1716_v6  ;;  %1472 = vmatmul.mubr.msk.f32.gmra.mrb[6].mxu0 %vm516_vm8, %v515_v35 }
  0xb3   : > { %v369_v22 = vadd.f32 %v368_v3, %v367_v57  ;;  %v383_v0 = vadd.f32 %v382_v18, %v381_v60  ;;  %v394_v23 = vrot.slane %v393_v19, 2  ;;  %1476 = vmatmul.mubr.msk.f32.gmra.mrb[6].mxu1 %vm516_vm8, %v515_v35  ;;  %v1863_v60 = vld [vmem:[%s239_s30] sm:$0xf] }
  0xb4   : > { %v408_v24 = vcombine.low %v357_v20, %v363_v62  ;;  %v440_v26 = vmax.f32 %v436_v16, 0.0  ;;  %v442_v29 = vmax.f32 %v438_v17, 0.0  ;;  %v1867_v61 = vrot.slane %v1863_v60, %v1731_v10  ;;  %v1869_v62 = vpop.permute.xlu1 %907 }
  0xb5   : > { %v409_v25 = vcombine.low %v369_v22, %v375_v63  ;;  %v384_v27 = vrot.slane %v383_v0, 1  ;;  %v395_v12 = vadd.f32 %v394_v23, %v393_v19  ;;  %v1871_v63 = vpop.permute.xlu0 %902  ;;  %v1875_v1 = vrot.slane %v1863_v60, %v1734_v11 }
  0xb6   : > { %v416_v13 = vrot.slane %v408_v24, %v1835_v21  ;;  %vm445_vm5 = vcmp.eq.f32.partialorder %v440_v26, 0.0  ;;  %vm447_vm6 = vcmp.eq.f32.partialorder %v442_v29, 0.0  ;;  %v1879_v3 = vrot.slane %v1863_v60, %v1726_v8 }
  0xb7   : > { %v423_v28 = vrot.slane %v409_v25, %v1835_v21  ;;  %v385_v30 = vadd.f32 %v384_v27, %v383_v0  ;;  %v396_v31 = vrot.slane %v395_v12, 1  ;;  %v449_v38 = vsel %vm445_vm5, 1, %v2124_v2 }
  0xb8   : > { %v451_v41 = vsel %vm447_vm6, 1, %v2124_v2  ;;  %v1883_v16 = vrot.slane %v1863_v60, %v1723_v7  ;;  %vm937_vm12 = vcmp.lt.f32.partialorder %v1869_v62, %v1867_v61  ;;  %vm933_vm13 = vcmp.lt.f32.partialorder %v1871_v63, %v1867_v61 }
  0xb9   : > { %v424_v32 = vcombine.low %v416_v13, %v423_v28  ;;  %v435_v33 = vsub.f32 %v385_v30, %v1746_v14  ;;  %v397_v34 = vadd.f32 %v396_v31, %v395_v12  ;;  %vm931_vm14 = vcmp.lt.f32.partialorder %v1871_v63, %v1875_v1 }
  0xba   : > { %vm932_vm15 = vcmp.lt.f32.partialorder %v1871_v63, %v1879_v3  ;;  %vm935_vm0 = vcmp.lt.f32.partialorder %v1869_v62, %v1875_v1  ;;  %vm936_vm1 = vcmp.lt.f32.partialorder %v1869_v62, %v1879_v3  ;;  %vm938_vm2 = vcmp.lt.f32.partialorder %v1869_v62, %v1883_v16 }
  0xbb   : > { %v431_v36 = vrot.slane %v424_v32, %v1835_v21  ;;  %v439_v35 = vmax.f32 %v435_v33, 0.0  ;;  %v437_v37 = vsub.f32 %v397_v34, %v1750_v15  ;;  %vm934_vm3 = vcmp.lt.f32.partialorder %v1871_v63, %v1883_v16 }
  0xbc   : > { %v945_v17 = vsel %vm937_vm12, 1, %v2124_v2  ;;  %v941_v18 = vsel %vm933_vm13, 1, %v2124_v2  ;;  %v939_v19 = vsel %vm931_vm14, 1, %v2124_v2  ;;  %v940_v20 = vsel %vm932_vm15, 1, %v2124_v2 }
  0xbd   : > { %vm444_vm7 = vcmp.eq.f32.partialorder %v439_v35, 0.0  ;;  %v483_v39 = vcombine.low %v439_v35, %v440_v26  ;;  %v441_v40 = vmax.f32 %v437_v37, 0.0  ;;  %v433_v43 = vsub.f32 %v1728_v9, %v431_v36 }
  0xbe   : > { %v448_v42 = vsel %vm444_vm7, 1, %v2124_v2  ;;  %v943_v22 = vsel %vm935_vm0, 1, %v2124_v2  ;;  %v944_v0 = vsel %vm936_vm1, 1, %v2124_v2  ;;  %v946_v23 = vsel %vm938_vm2, 1, %v2124_v2 }
  0xbf   : > { %vm446_vm8 = vcmp.eq.f32.partialorder %v441_v40, 0.0  ;;  %v484_v14 = vcombine.low %v441_v40, %v442_v29  ;;  %v452_v44 = vcombine.low %v448_v42, %v449_v38  ;;  %v491_v45 = vrot.slane %v483_v39, %v1835_v21 }
  0xc0   : > { %v450_v46 = vsel %vm446_vm8, 1, %v2124_v2  ;;  %v434_v49 = vmax.f32 %v433_v43, 0.0  ;;  %v942_v24 = vsel %vm934_vm3, 1, %v2124_v2  ;;  %v961_v25 = vadd.s32 %v945_v17, %v941_v18 }
  0xc1   : > { %v453_v47 = vcombine.low %v450_v46, %v451_v41  ;;  %v460_v15 = vrot.slane %v452_v44, %v1835_v21  ;;  %v498_v48 = vrot.slane %v484_v14, %v1835_v21  ;;  %v947_v26 = vadd.s32 %v943_v22, %v939_v19 }
  0xc2   : > { %vm443_vm9 = vcmp.eq.f32.partialorder %v434_v49, 0.0  ;;  %v954_v27 = vadd.s32 %v944_v0, %v940_v20  ;;  %v968_v12 = vadd.s32 %v946_v23, %v942_v24  ;;  %v962_v13 = vrot.slane %v961_v25, 4 }
  0xc3   : > { %v467_v50 = vrot.slane %v453_v47, %v1835_v21  ;;  %v499_v51 = vcombine.low %v491_v45, %v498_v48  ;;  %v948_v28 = vrot.slane %v947_v26, 4  ;;  %v995_v19 = vadd.s32 8, %v1716_v6 }
  0xc4   : > { %v955_v29 = vrot.slane %v954_v27, 4  ;;  %v969_v30 = vrot.slane %v968_v12, 4  ;;  %v963_v31 = vadd.s32 %v962_v13, %v961_v25 }
  0xc5   : > { %v468_v52 = vcombine.low %v460_v15, %v467_v50  ;;  %v506_v53 = vrot.slane %v499_v51, %v1835_v21  ;;  %v949_v32 = vadd.s32 %v948_v28, %v947_v26 }
  0xc6   : > { %v956_v33 = vadd.s32 %v955_v29, %v954_v27  ;;  %v970_v34 = vadd.s32 %v969_v30, %v968_v12  ;;  %v964_v36 = vrot.slane %v963_v31, 2 }
  0xc7   : > { %v475_v9 = vrot.slane %v468_v52, %v1835_v21  ;;  %v950_v35 = vrot.slane %v949_v32, 2 }
  0xc8   : > { %v957_v37 = vrot.slane %v956_v33, 2  ;;  %v971_v38 = vrot.slane %v970_v34, 2  ;;  %v965_v39 = vadd.s32 %v964_v36, %v963_v31 }
  0xc9   : > { %vm476_vm10 = vcmp.ne.s32.totalorder %v475_v9, 0  ;;  %v951_v40 = vadd.s32 %v950_v35, %v949_v32 }
  0xca   : > { %vm477_vm11 = vmand %vm443_vm9, %vm476_vm10  ;;  %v958_v41 = vadd.s32 %v957_v37, %v956_v33  ;;  %v972_v42 = vadd.s32 %v971_v38, %v970_v34  ;;  %v966_v43 = vrot.slane %v965_v39, 1 }
  0xcb   : > { %v478_v54 = vsel %vm477_vm11, 1.0, %v434_v49  ;;  %v508_v55 = vsel %vm477_vm11, 1.0, %v506_v53  ;;  %v952_v14 = vrot.slane %v951_v40, 1 }
  0xcc   : > { %v509_v56 = vadd.f32 %v508_v55, %v478_v54  ;;  %v959_v44 = vrot.slane %v958_v41, 1  ;;  %v973_v45 = vrot.slane %v972_v42, 1  ;;  %v967_v46 = vadd.s32 %v966_v43, %v965_v39 }
  0xcd   : > { %v953_v47 = vadd.s32 %v952_v14, %v951_v40 }
  0xce   : > { %1548 = vrcp.f32 %v509_v56  ;;  %v960_v15 = vadd.s32 %v959_v44, %v958_v41  ;;  %v974_v48 = vadd.s32 %v973_v45, %v972_v42  ;;  %vm979_vm6 = vcmp.lt.s32.totalorder %v967_v46, 15 }
  0xcf   : > { %vm975_vm4 = vcmp.lt.s32.totalorder %v953_v47, 15  ;;  %v980_v51 = vsel %vm979_vm6, %v967_v46, 15 }
  0xd0   : > { %vm977_vm5 = vcmp.lt.s32.totalorder %v960_v15, 15  ;;  %vm981_vm7 = vcmp.lt.s32.totalorder %v974_v48, 15  ;;  %v976_v49 = vsel %vm975_vm4, %v953_v47, 15  ;;  %vm1022_vm6 = vcmp.eq.s32.totalorder %v1716_v6, %v980_v51 }
  0xd1   : > { %v978_v50 = vsel %vm977_vm5, %v960_v15, 15  ;;  %v982_v52 = vsel %vm981_vm7, %v974_v48, 15  ;;  %v1477_v9 = vadd.s32 4294967295, %v976_v49  ;;  %vm1020_vm4 = vcmp.eq.s32.totalorder %v1716_v6, %v976_v49 }
  0xd2   : > { %v1478_v53 = vadd.s32 4294967295, %v978_v50  ;;  %vm1021_vm5 = vcmp.eq.s32.totalorder %v1716_v6, %v978_v50  ;;  %vm1023_vm7 = vcmp.eq.s32.totalorder %v1716_v6, %v982_v52  ;;  %v1937_v24 = vsel %vm1020_vm4, 1.0, %v1617_v4 }
  0xd3   : > { %vm987_vm8 = vcmp.gt.s32.totalorder %v1477_v9, 0  ;;  %v1940_v25 = vsel %vm1021_vm5, 1.0, %v1617_v4  ;;  %v1943_v26 = vsel %vm1022_vm6, 1.0, %v1617_v4  ;;  %v1946_v27 = vsel %vm1023_vm7, 1.0, %v1617_v4 }
  0xd4   : > { %vm989_vm9 = vcmp.gt.s32.totalorder %v1478_v53, 0  ;;  %v988_v56 = vsel %vm987_vm8, %v1477_v9, 0  ;;  %vm1024_vm8 = vcmp.eq.s32.totalorder %v995_v19, %v976_v49  ;;  %v1080_v33 = vmul.f32 %v1937_v24, %v1871_v63 }
  0xd5   : > { %vm996_vm12 = vcmp.eq.s32.totalorder %v1716_v6, %v988_v56  ;;  %vm1000_vm15 = vcmp.eq.s32.totalorder %v995_v19, %v988_v56  ;;  %v1949_v12 = vsel %vm1024_vm8, 1.0, %v1617_v4  ;;  %v1081_v34 = vmul.f32 %v1940_v25, %v1871_v63 }
  0xd6   : > { %v1921_v20 = vsel %vm996_vm12, 1.0, %v1617_v4  ;;  %v1962_v29 = vsel %vm1000_vm15, 1.0, %v1617_v4  ;;  %v1082_v36 = vmul.f32 %v1943_v26, %v1871_v63  ;;  %v1083_v35 = vmul.f32 %v1946_v27, %v1871_v63 }
  0xd7   : > { %v1084_v37 = vmul.f32 %v1949_v12, %v1869_v62  ;;  %v1044_v40 = vmul.f32 %v1921_v20, %v1871_v63  ;;  %v1048_v14 = vmul.f32 %v1962_v29, %v1869_v62 }
  0xd8   : > { %v1549_v57 = vpop.eup %1548 }
  0xd9   : > { %v1859_v58 = vmul.f32 %v1549_v57, %v508_v55  ;;  %v1861_v59 = vmul.f32 %v1549_v57, %v478_v54  ;;  %v1479_v54 = vadd.s32 4294967295, %v980_v51  ;;  %v1480_v55 = vadd.s32 4294967295, %v982_v52 }
  0xda   : > { %v990_v57 = vsel %vm989_vm9, %v1478_v53, 0  ;;  %vm1025_vm9 = vcmp.eq.s32.totalorder %v995_v19, %v978_v50  ;;  %v1088_v47 = vadd.f32 %v1084_v37, %v1080_v33  ;;  %v1052_v50 = vadd.f32 %v1048_v14, %v1044_v40 }
  0xdb   : > { %vm991_vm10 = vcmp.gt.s32.totalorder %v1479_v54, 0  ;;  %vm993_vm11 = vcmp.gt.s32.totalorder %v1480_v55, 0  ;;  %vm997_vm13 = vcmp.eq.s32.totalorder %v1716_v6, %v990_v57  ;;  %vm1001_vm1 = vcmp.eq.s32.totalorder %v995_v19, %v990_v57 }
  0xdc   : > { %v992_v17 = vsel %vm991_vm10, %v1479_v54, 0  ;;  %v994_v18 = vsel %vm993_vm11, %v1480_v55, 0  ;;  %vm1026_vm10 = vcmp.eq.s32.totalorder %v995_v19, %v980_v51  ;;  %vm1027_vm11 = vcmp.eq.s32.totalorder %v995_v19, %v982_v52 }
  0xdd   : > { %vm998_vm14 = vcmp.eq.s32.totalorder %v1716_v6, %v992_v17  ;;  %vm999_vm0 = vcmp.eq.s32.totalorder %v1716_v6, %v994_v18  ;;  %vm1002_vm2 = vcmp.eq.s32.totalorder %v995_v19, %v992_v17  ;;  %vm1003_vm3 = vcmp.eq.s32.totalorder %v995_v19, %v994_v18 }
  0xde   : > { %v1926_v22 = vsel %vm997_vm13, 1.0, %v1617_v4  ;;  %v1931_v0 = vsel %vm998_vm14, 1.0, %v1617_v4  ;;  %v1934_v23 = vsel %vm999_vm0, 1.0, %v1617_v4  ;;  %v1952_v6 = vsel %vm1025_vm9, 1.0, %v1617_v4 }
  0xdf   : > { %v1955_v13 = vsel %vm1026_vm10, 1.0, %v1617_v4  ;;  %v1958_v28 = vsel %vm1027_vm11, 1.0, %v1617_v4  ;;  %v1966_v30 = vsel %vm1001_vm1, 1.0, %v1617_v4  ;;  %v1970_v31 = vsel %vm1002_vm2, 1.0, %v1617_v4 }
  0xe0   : > { %v1974_v32 = vsel %vm1003_vm3, 1.0, %v1617_v4  ;;  %v1085_v38 = vmul.f32 %v1952_v6, %v1869_v62  ;;  %v1086_v4 = vmul.f32 %v1955_v13, %v1869_v62  ;;  %v1087_v39 = vmul.f32 %v1958_v28, %v1869_v62 }
  0xe1   : > { %v1045_v41 = vmul.f32 %v1926_v22, %v1871_v63  ;;  %v1046_v42 = vmul.f32 %v1931_v0, %v1871_v63  ;;  %v1047_v43 = vmul.f32 %v1934_v23, %v1871_v63  ;;  %v1049_v44 = vmul.f32 %v1966_v30, %v1869_v62 }
  0xe2   : > { %v1050_v45 = vmul.f32 %v1970_v31, %v1869_v62  ;;  %v1051_v46 = vmul.f32 %v1974_v32, %v1869_v62  ;;  %v1095_v15 = vadd.f32 %v1085_v38, %v1081_v34  ;;  %v1102_v48 = vadd.f32 %v1086_v4, %v1082_v36 }
  0xe3   : > { %v1109_v49 = vadd.f32 %v1087_v39, %v1083_v35  ;;  %v1059_v51 = vadd.f32 %v1049_v44, %v1045_v41  ;;  %v1089_v9 = vrot.slane %v1088_v47, 4  ;;  %v1053_v56 = vrot.slane %v1052_v50, 4 }
  0xe4   : > { %v1066_v52 = vadd.f32 %v1050_v45, %v1046_v42  ;;  %v1073_v63 = vadd.f32 %v1051_v46, %v1047_v43  ;;  %v1096_v53 = vrot.slane %v1095_v15, 4  ;;  %v1103_v54 = vrot.slane %v1102_v48, 4 }
  0xe5   : > { %v1110_v55 = vrot.slane %v1109_v49, 4  ;;  %v1060_v57 = vrot.slane %v1059_v51, 4  ;;  %v1090_v19 = vadd.f32 %v1089_v9, %v1088_v47  ;;  %v1054_v33 = vadd.f32 %v1053_v56, %v1052_v50 }
  0xe6   : > { %v1067_v17 = vrot.slane %v1066_v52, 4  ;;  %v1074_v18 = vrot.slane %v1073_v63, 4  ;;  %v1097_v5 = vadd.f32 %v1096_v53, %v1095_v15  ;;  %v1104_v2 = vadd.f32 %v1103_v54, %v1102_v48 }
  0xe7   : > { %v1111_v62 = vadd.f32 %v1110_v55, %v1109_v49  ;;  %v1061_v34 = vadd.f32 %v1060_v57, %v1059_v51  ;;  %v1091_v37 = vrot.slane %v1090_v19, 2  ;;  %v1055_v40 = vrot.slane %v1054_v33, 2 }
  0xe8   : > { %v1068_v36 = vadd.f32 %v1067_v17, %v1066_v52  ;;  %v1075_v35 = vadd.f32 %v1074_v18, %v1073_v63  ;;  %v1098_v38 = vrot.slane %v1097_v5, 2  ;;  %v1105_v4 = vrot.slane %v1104_v2, 2 }
  0xe9   : > { %v1112_v39 = vrot.slane %v1111_v62, 2  ;;  %v1062_v41 = vrot.slane %v1061_v34, 2  ;;  %v1092_v14 = vadd.f32 %v1091_v37, %v1090_v19  ;;  %v1056_v47 = vadd.f32 %v1055_v40, %v1054_v33 }
  0xea   : > { %v1069_v42 = vrot.slane %v1068_v36, 2  ;;  %v1076_v43 = vrot.slane %v1075_v35, 2  ;;  %v1099_v44 = vadd.f32 %v1098_v38, %v1097_v5  ;;  %v1106_v45 = vadd.f32 %v1105_v4, %v1104_v2 }
  0xeb   : > { %v1113_v46 = vadd.f32 %v1112_v39, %v1111_v62  ;;  %v1063_v15 = vadd.f32 %v1062_v41, %v1061_v34  ;;  %v1093_v50 = vrot.slane %v1092_v14, 1  ;;  %v1057_v9 = vrot.slane %v1056_v47, 1 }
  0xec   : > { %v1070_v48 = vadd.f32 %v1069_v42, %v1068_v36  ;;  %v1077_v49 = vadd.f32 %v1076_v43, %v1075_v35  ;;  %v1100_v51 = vrot.slane %v1099_v44, 1  ;;  %v1107_v52 = vrot.slane %v1106_v45, 1 }
  0xed   : > { %v1114_v63 = vrot.slane %v1113_v46, 1  ;;  %v1064_v53 = vrot.slane %v1063_v15, 1  ;;  %v1094_v56 = vadd.f32 %v1093_v50, %v1092_v14  ;;  %v1058_v19 = vadd.f32 %v1057_v9, %v1056_v47 }
  0xee   : > { %v1071_v54 = vrot.slane %v1070_v48, 1  ;;  %v1078_v55 = vrot.slane %v1077_v49, 1  ;;  %v1101_v57 = vadd.f32 %v1100_v51, %v1099_v44  ;;  %v1108_v17 = vadd.f32 %v1107_v52, %v1106_v45 }
  0xef   : > { %v1115_v18 = vadd.f32 %v1114_v63, %v1113_v46  ;;  %v1065_v5 = vadd.f32 %v1064_v53, %v1063_v15  ;;  %v1147_v33 = vsub.f32 %v1094_v56, %v1875_v1  ;;  %v2128_v1 = vmov 0  }
  0xf0   : > { %v1072_v2 = vadd.f32 %v1071_v54, %v1070_v48  ;;  %v1079_v62 = vadd.f32 %v1078_v55, %v1077_v49  ;;  %v1148_v34 = vsub.f32 %v1101_v57, %v1879_v3  ;;  %v1149_v36 = vsub.f32 %v1108_v17, %v1867_v61 }
  0xf1   : > { %v1150_v35 = vsub.f32 %v1115_v18, %v1883_v16  ;;  %v1120_v37 = vcombine.low %v1058_v19, %v1065_v5  ;;  %v1151_v4 = vmax.f32 %v1147_v33, 0.0  ;;  %v839_v33 = vrot.slane %v1859_v58, %v1726_v8 }
  0xf2   : > { %v1121_v38 = vcombine.low %v1072_v2, %v1079_v62  ;;  %v1152_v39 = vmax.f32 %v1148_v34, 0.0  ;;  %v1153_v40 = vmax.f32 %v1149_v36, 0.0  ;;  %v835_v2 = vrot.slane %v1859_v58, %v1734_v11 }
  0xf3   : > { %v1154_v41 = vmax.f32 %v1150_v35, 0.0  ;;  %v1128_v42 = vrot.slane %v1120_v37, %v1835_v21  ;;  %vm1156_vm12 = vcmp.eq.f32.partialorder %v1151_v4, 0.0  ;;  %v843_v62 = vrot.slane %v1859_v58, %v1731_v10 }
  0xf4   : > { %v1135_v43 = vrot.slane %v1121_v38, %v1835_v21  ;;  %vm1157_vm13 = vcmp.eq.f32.partialorder %v1152_v39, 0.0  ;;  %vm1158_vm14 = vcmp.eq.f32.partialorder %v1153_v40, 0.0  ;;  %v1160_v3 = vsel %vm1156_vm12, 1, %v2128_v1 }
  0xf5   : > { %vm1159_vm15 = vcmp.eq.f32.partialorder %v1154_v41, 0.0  ;;  %v1161_v61 = vsel %vm1157_vm13, 1, %v2128_v1  ;;  %v1162_v16 = vsel %vm1158_vm14, 1, %v2128_v1  ;;  %v1195_v50 = vcombine.low %v1151_v4, %v1152_v39 }
  0xf6   : > { %v1163_v14 = vsel %vm1159_vm15, 1, %v2128_v1  ;;  %v1136_v44 = vcombine.low %v1128_v42, %v1135_v43  ;;  %v1164_v45 = vcombine.low %v1160_v3, %v1161_v61  ;;  %v1196_v51 = vcombine.low %v1153_v40, %v1154_v41 }
  0xf7   : > { %v1165_v46 = vcombine.low %v1162_v16, %v1163_v14  ;;  %v1203_v9 = vrot.slane %v1195_v50, %v1835_v21  ;;  %v847_v36 = vrot.slane %v1859_v58, %v1723_v7 }
  0xf8   : > { %v1143_v47 = vrot.slane %v1136_v44, %v1835_v21  ;;  %v1172_v15 = vrot.slane %v1164_v45, %v1835_v21  ;;  %v1210_v53 = vrot.slane %v1196_v51, %v1835_v21 }
  0xf9   : > { %v1179_v48 = vrot.slane %v1165_v46, %v1835_v21 }
  0xfa   : > { %v1145_v49 = vsub.f32 %v1863_v60, %v1143_v47  ;;  %v1211_v55 = vcombine.low %v1203_v9, %v1210_v53 }
  0xfb   : > { %v1180_v52 = vcombine.low %v1172_v15, %v1179_v48 }
  0xfc   : > { %v1146_v63 = vmax.f32 %v1145_v49, 0.0  ;;  %v1218_v56 = vrot.slane %v1211_v55, %v1835_v21  ;;  %v864_v55 = vrot.slane %v1861_v59, %v1734_v11 }
  0xfd   : > { %v1187_v54 = vrot.slane %v1180_v52, %v1835_v21 }
  0xfe   : > { %vm1155_vm0 = vcmp.eq.f32.partialorder %v1146_v63, 0.0 }
  0xff   : > { %vm1188_vm1 = vcmp.ne.s32.totalorder %v1187_v54, 0 }
 0x100   : > { %vm1189_vm2 = vmand %vm1155_vm0, %vm1188_vm1 }
 0x101   : > { %v1190_v57 = vsel %vm1189_vm2, 1.0, %v1146_v63  ;;  %v1220_v17 = vsel %vm1189_vm2, 1.0, %v1218_v56 }
 0x102   : > { %v1221_v18 = vadd.f32 %v1220_v17, %v1190_v57 }
 0x104   : > { %1550 = vrcp.f32 %v1221_v18 }
 0x10e   : > { %v1551_v60 = vpop.eup %1550 }
 0x10f   : > { %v1224_v19 = vmul.f32 %v1551_v60, %v1190_v57  ;;  %v1225_v5 = vmul.f32 %v1551_v60, %v1220_v17 }
 0x111   : > { %v1230_v35 = vrot.slane %v1225_v5, %v1734_v11  ;;  %v1259_v37 = vrot.slane %v1224_v19, %v1734_v11  ;;  %v1238_v38 = vrot.slane %v1225_v5, %v1731_v10  ;;  %v1267_v41 = vrot.slane %v1224_v19, %v1731_v10 }
 0x112   : > { %v1234_v42 = vrot.slane %v1225_v5, %v1726_v8  ;;  %v1263_v43 = vrot.slane %v1224_v19, %v1726_v8  ;;  %v1242_v58 = vrot.slane %v1225_v5, %v1723_v7  ;;  %v1271_v16 = vrot.slane %v1224_v19, %v1723_v7 }
 0x113   : > { %v1247_v44 = vmul.f32 %v1921_v20, %v1230_v35  ;;  %v1276_v45 = vmul.f32 %v1937_v24, %v1259_v37  ;;  %v1249_v15 = vmul.f32 %v1931_v0, %v1238_v38  ;;  %v1278_v48 = vmul.f32 %v1943_v26, %v1267_v41 }
 0x114   : > { %v1248_v49 = vmul.f32 %v1926_v22, %v1234_v42  ;;  %v1277_v50 = vmul.f32 %v1940_v25, %v1263_v43  ;;  %v1250_v53 = vmul.f32 %v1934_v23, %v1242_v58  ;;  %v1279_v20 = vmul.f32 %v1946_v27, %v1271_v16 }
 0x115   : > { %v872_v0 = vrot.slane %v1861_v59, %v1731_v10  ;;  %v868_v22 = vrot.slane %v1861_v59, %v1726_v8  ;;  %v876_v25 = vrot.slane %v1861_v59, %v1723_v7  ;;  %v1284_v56 = vadd.f32 %v1276_v45, %v1247_v44 }
 0x116   : > { %v1286_v23 = vadd.f32 %v1278_v48, %v1249_v15  ;;  %v1251_v27 = vmul.f32 %v1962_v29, %v1230_v35  ;;  %v1280_v17 = vmul.f32 %v1949_v12, %v1259_v37  ;;  %v1285_v19 = vadd.f32 %v1277_v50, %v1248_v49 }
 0x117   : > { %v1287_v10 = vadd.f32 %v1279_v20, %v1250_v53  ;;  %v1253_v8 = vmul.f32 %v1970_v31, %v1238_v38  ;;  %v1282_v7 = vmul.f32 %v1955_v13, %v1267_v41  ;;  %v1281_v29 = vmul.f32 %v1952_v6, %v1263_v43 }
 0x118   : > { %v1288_v6 = vadd.f32 %v1280_v17, %v1251_v27 }
 0x179   : > { %v589_v34 = vpop.f32.mrb[0].mxu0  ;;  %v666_v39 = vpop.f32.mrb[0].mxu1 }
 0x17a   : > { %v852_v4 = vmul.f32 %v835_v2, %v589_v34  ;;  %v591_v40 = vpop.f32.mrb[1].mxu0  ;;  %v854_v1 = vmul.f32 %v843_v62, %v666_v39  ;;  %v668_v61 = vpop.f32.mrb[1].mxu1  ;;  %v1252_v34 = vmul.f32 %v1966_v30, %v1234_v42  ;;  %v1254_v39 = vmul.f32 %v1974_v32, %v1242_v58 }
 0x17b   : > { %v853_v3 = vmul.f32 %v839_v33, %v591_v40  ;;  %v855_v14 = vmul.f32 %v847_v36, %v668_v61  ;;  %v1283_v40 = vmul.f32 %v1958_v28, %v1271_v16 }
 0x17d   : > { %v595_v46 = vpop.f32.mrb[2].mxu0  ;;  %v672_v47 = vpop.f32.mrb[2].mxu1  ;;  %v1291_v32 = vadd.f32 %v1283_v40, %v1254_v39 }
 0x17e   : > { %v856_v51 = vmul.f32 %v835_v2, %v595_v46  ;;  %v858_v52 = vmul.f32 %v843_v62, %v672_v47  ;;  %v597_v63 = vpop.f32.mrb[3].mxu0  ;;  %v674_v9 = vpop.f32.mrb[3].mxu1  ;;  %v1289_v46 = vadd.f32 %v1281_v29, %v1252_v34  ;;  %v2129_v34 = vlaneseq }
 0x17f   : > { %v857_v54 = vmul.f32 %v839_v33, %v597_v63  ;;  %v859_v24 = vmul.f32 %v847_v36, %v674_v9 }
 0x180   : > { %vm1359_vm3 = vcmp.lt.s32.totalorder %v2129_v34, 512 }
 0x181   : > { %v743_v26 = vpop.f32.mrb[4].mxu0  ;;  %v820_v57 = vpop.f32.mrb[4].mxu1 }
 0x182   : > { %v881_v18 = vmul.f32 %v864_v55, %v743_v26  ;;  %v883_v60 = vmul.f32 %v872_v0, %v820_v57  ;;  %v745_v11 = vpop.f32.mrb[5].mxu0  ;;  %v822_v5 = vpop.f32.mrb[5].mxu1 }
 0x183   : > { %v882_v2 = vmul.f32 %v868_v22, %v745_v11  ;;  %v884_v62 = vmul.f32 %v876_v25, %v822_v5 }
 0x184   : > { %v889_v59 = vadd.f32 %v881_v18, %v852_v4  ;;  %v891_v33 = vadd.f32 %v883_v60, %v854_v1 }
 0x185   : > { %v890_v36 = vadd.f32 %v882_v2, %v853_v3  ;;  %v892_v12 = vadd.f32 %v884_v62, %v855_v14  ;;  %v749_v35 = vpop.f32.mrb[6].mxu0  ;;  %v1290_v3 = vadd.f32 %v1282_v7, %v1253_v8 }
 0x186   : > { %v826_v37 = vpop.f32.mrb[6].mxu1  ;;  %v1292_v61 = vmul.f32 %v1284_v56, %v889_v59  ;;  %v1294_v44 = vmul.f32 %v1286_v23, %v891_v33  ;;  %v885_v45 = vmul.f32 %v864_v55, %v749_v35  ;;  %v751_v38 = vpop.f32.mrb[7].mxu0 }
 0x187   : > { %v887_v31 = vmul.f32 %v872_v0, %v826_v37  ;;  %v828_v13 = vpop.f32.mrb[7].mxu1  ;;  %v1293_v4 = vmul.f32 %v1285_v19, %v890_v36  ;;  %v1295_v41 = vmul.f32 %v1287_v10, %v892_v12  ;;  %v886_v1 = vmul.f32 %v868_v22, %v751_v38 }
 0x188   : > { %v888_v30 = vmul.f32 %v876_v25, %v828_v13  ;;  %v893_v42 = vadd.f32 %v885_v45, %v856_v51 }
 0x189   : > { %v895_v43 = vadd.f32 %v887_v31, %v858_v52  ;;  %v894_v14 = vadd.f32 %v886_v1, %v857_v54 }
 0x18a   : > { %v896_v47 = vadd.f32 %v888_v30, %v859_v24  ;;  %v1296_v58 = vmul.f32 %v1288_v6, %v893_v42 }
 0x18b   : > { %v1298_v28 = vmul.f32 %v1290_v3, %v895_v43  ;;  %v1297_v16 = vmul.f32 %v1289_v46, %v894_v14 }
 0x18c   : > { %v1299_v15 = vmul.f32 %v1291_v32, %v896_v47  ;;  %v1300_v48 = vadd.f32 %v1296_v58, %v1292_v61 }
 0x18d   : > { %v1314_v49 = vadd.f32 %v1298_v28, %v1294_v44  ;;  %v1307_v50 = vadd.f32 %v1297_v16, %v1293_v4 }
 0x18e   : > { %v1321_v63 = vadd.f32 %v1299_v15, %v1295_v41  ;;  %v1301_v9 = vrot.slane %v1300_v48, 4 }
 0x18f   : > { %v1315_v53 = vrot.slane %v1314_v49, 4  ;;  %v1308_v20 = vrot.slane %v1307_v50, 4 }
 0x190   : > { %v1322_v51 = vrot.slane %v1321_v63, 4  ;;  %v1302_v55 = vadd.f32 %v1301_v9, %v1300_v48 }
 0x191   : > { %v1316_v52 = vadd.f32 %v1315_v53, %v1314_v49  ;;  %v1309_v0 = vadd.f32 %v1308_v20, %v1307_v50 }
 0x192   : > { %v1323_v54 = vadd.f32 %v1322_v51, %v1321_v63  ;;  %v1303_v22 = vrot.slane %v1302_v55, 2 }
 0x193   : > { %v1317_v24 = vrot.slane %v1316_v52, 2  ;;  %v1310_v25 = vrot.slane %v1309_v0, 2 }
 0x194   : > { %v1324_v26 = vrot.slane %v1323_v54, 2  ;;  %v1304_v56 = vadd.f32 %v1303_v22, %v1302_v55 }
 0x195   : > { %v1318_v57 = vadd.f32 %v1317_v24, %v1316_v52  ;;  %v1311_v23 = vadd.f32 %v1310_v25, %v1309_v0 }
 0x196   : > { %v1325_v27 = vadd.f32 %v1324_v26, %v1323_v54  ;;  %v1305_v17 = vrot.slane %v1304_v56, 1 }
 0x197   : > { %v1319_v18 = vrot.slane %v1318_v57, 1  ;;  %v1312_v60 = vrot.slane %v1311_v23, 1 }
 0x198   : > { %v1326_v11 = vrot.slane %v1325_v27, 1  ;;  %v1306_v19 = vadd.f32 %v1305_v17, %v1304_v56 }
 0x199   : > { %v1320_v5 = vadd.f32 %v1319_v18, %v1318_v57  ;;  %v1313_v10 = vadd.f32 %v1312_v60, %v1311_v23 }
 0x19a   : > { %v1327_v2 = vadd.f32 %v1326_v11, %v1325_v27 }
 0x19b   : > { %v1332_v62 = vcombine.low %v1306_v19, %v1313_v10 }
 0x19c   : > { %v1333_v8 = vcombine.low %v1320_v5, %v1327_v2 }
 0x19d   : > { %v1340_v7 = vrot.slane %v1332_v62, %v1835_v21 }
 0x19e   : > { %v1347_v59 = vrot.slane %v1333_v8, %v1835_v21 }
 0x1a0   : > { %v1348_v33 = vcombine.low %v1340_v7, %v1347_v59 }
 0x1a2   : > { %v1355_v29 = vrot.slane %v1348_v33, %v1835_v21 }
 0x1a4   : > { %1361 = vst.msk [vmem:[%s230_s9] sm:$0xf] %vm1359_vm3, %v1355_v29 }
 0x1a5   : > { %1565 = shalt.err (!%p1562_p3)
}
 0x1a6   : > { %s1566_s23 = scalar_lea.hbm %s2075_s13, 64  ;;  %s1570_s30 = scalar_lea.hbm %s2122_s5, 128 }
 0x1a7   : > { %p1567_p4 = scmp.ne.s32.totalorder %s2075_s13, %s1566_s23  ;;  %p1571_p9 = scmp.lt.u32.totalorder %s2075_s13, %s2122_s5 }
 0x1a8   : > { %p1572_p10 = scmp.lt.u32.totalorder %s1570_s30, %s1566_s23  ;;  %p1574_p12 = scmp.lt.u32.totalorder %s1566_s23, %s2075_s13 }
 0x1a9   : > { %p1568_p7 = pnand %p1567_p4, %p1689_p5 }
 0x1aa   : > { %p1573_p11 = por %p1572_p10, %p1571_p9 }
 0x1ab   : > { %p1569_p8 = pneg %p1568_p7 }
 0x1ac   : > { %p1575_p13 = por %p1574_p12, %p1573_p11 }
 0x1ae   : > { %p1576_p0 = pnand %p1575_p13, %p1569_p8 }
 0x1b0   : > { %1579 = shalt.err (!%p1576_p0)
}
 0x1b1   : > { %1503 = dma.vmem_to_hbm [thread:$0]  (%p1689_p5), %s2077_s10, 64, %s2075_s13, %s1363_s14  }
 0x1b2 PF: > { %p1509_p1 = scmp.ge.s32.totalorder %s1614_s21, 2  ;;  %s1389_s8 = sand.u32 1, %s1602_s18  }
 0x1b3   : > { %s1390_s9 = scalar_lea.sflag [#allocation3], %s1389_s8 }
 0x1b4   : > { %p1506_p2 = pnand %p1509_p1, %p1693_p6 }
 0x1b6   : > { %1597 = dma.done.wait (!%p1506_p2), %s1390_s9, 64  }
 0x1b7   : > { %1599 = vsyncadd (!%p1506_p2), %s1390_s9, 4294967232  ;;  %p15_p3 = scmp.ge.s32.totalorder %s1676_s24, 4   ;;  %s2130_s18 = smov %s1606_s19 }
 0x1b8   : > { %s2131_s19 = smov %s1610_s20  ;;  %s2132_s20 = smov %s1687_s27 }
 0x1b9   : > { %s2133_s21 = smov %s1676_s24  ;;  %17 = sbr.rel (!%p15_p3) target bundleno = 3 (0x3), region = 78 }
 0x1c0   :  { %1395 = vsyncpa [#allocation3], 1 }
 0x1c1   :  { %1397 = vsyncpa [#allocation3 + $0x1], 1 }

</bundles_post_ra>
